<compile_context>
chip_gen: v6e
topology: v6e:2x2x1
jax: 0.10.0
libtpu: 0.0.40
codegen_flags: <defaults>
</compile_context>

<pallas_src>
import jax
import jax.numpy as jnp
from jax.experimental import pallas as pl
from jax.experimental.pallas import tpu as pltpu


def _round_up(x, m):
    return ((x + m - 1) // m) * m


def _fusion_kernel(text_ref, tech_ref, wt_ref, wk_ref, b_ref, o_ref):
    # concat(text, tech) @ [Wt; Wk] == text @ Wt + tech @ Wk
    # (mathematically identical to the PyTorch concat + Linear forward).
    cdt = wt_ref.dtype
    xt = text_ref[...].astype(cdt)        # in-kernel cast (no-op on f32 path)
    xk = tech_ref[...].astype(cdt)
    acc = jnp.dot(xt, wt_ref[...], preferred_element_type=jnp.float32)
    acc = acc + jnp.dot(xk, wk_ref[...], preferred_element_type=jnp.float32)
    acc = acc + b_ref[...]                # bias kept f32 (v5e VPU has no bf16)
    o_ref[...] = acc.astype(o_ref.dtype)


def prepare_fusion_params(weight, bias, text_dim, compute_dtype=jnp.float32):
    """One-time (parameter-load-time) prep.  NOT part of the per-step forward.

    weight: [O, Dt + Dk]  (PyTorch nn.Linear layout)
    bias:   [O]
    Returns (w_text [Dt, O], w_tech [Dk, O], bias2d f32 [1, O]).
    No output-dim padding: the kernel emits the unpadded (B, O) result.
    """
    out_dim, _ = weight.shape
    w_text = jnp.transpose(weight[:, :text_dim]).astype(compute_dtype)  # [Dt, O]
    w_tech = jnp.transpose(weight[:, text_dim:]).astype(compute_dtype)  # [Dk, O]
    b2d = bias.reshape(1, out_dim).astype(jnp.float32)
    return w_text, w_tech, b2d


def _vmem_capacity_bytes():
    try:
        cap = int(pltpu.get_tpu_info().vmem_capacity_bytes)
        if cap > 0:
            return cap
    except Exception:
        pass
    return 64 << 20  # conservative fallback (v7x per-TC VMEM)


def simple_fusion_forward(text_features, technical_features, params, *,
                          tm=4096, out_dtype=jnp.float32):
    """Pallas forward of SimpleFusionModule: y = concat(text, tech) @ W.T + b."""
    w_text, w_tech, b2d = params
    batch, text_dim = text_features.shape
    _, tech_dim = technical_features.shape
    out_dim = w_text.shape[1]
    compute_dtype = w_text.dtype
    wbytes = jnp.dtype(compute_dtype).itemsize
    xbytes = jnp.dtype(text_features.dtype).itemsize
    obytes = jnp.dtype(out_dtype).itemsize

    # Batch tile: biggest requested tile (multiple of 8 sublanes) or full batch.
    if batch <= tm:
        tm = batch
    else:
        tm = max(8, (tm // 8) * 8)
    # v7x megacore: for large batches make sure the parallel grid has >= 2
    # steps so both TensorCores get work (harmless on 1-TC v5e/v6e).
    if batch >= 1024 and tm >= batch:
        tm = _round_up((batch + 1) // 2, 8)
    grid = (pl.cdiv(batch, tm),)

    # VMEM budget: double-buffered activation/output tiles + (single-buffered)
    # resident weights/bias + slack, capped below physical VMEM per generation.
    act_tile = tm * (text_dim + tech_dim) * xbytes
    out_tile = tm * out_dim * obytes
    resident = (text_dim + tech_dim) * out_dim * wbytes + out_dim * 4
    vmem_est = 2 * (act_tile + out_tile) + resident + (4 << 20)
    vmem_cap = (_vmem_capacity_bytes() * 7) // 8      # headroom for Mosaic scratch
    vmem_limit = int(min(max(vmem_est, 8 << 20), vmem_cap))

    flops = 2 * batch * (text_dim + tech_dim) * out_dim + batch * out_dim
    bytes_accessed = (batch * (text_dim + tech_dim) * xbytes   # activations in
                      + (text_dim + tech_dim) * out_dim * wbytes  # weights in
                      + out_dim * 4                               # bias in
                      + batch * out_dim * obytes)                 # output out

    return pl.pallas_call(
        _fusion_kernel,
        out_shape=jax.ShapeDtypeStruct((batch, out_dim), out_dtype),
        grid_spec=pltpu.PrefetchScalarGridSpec(
            num_scalar_prefetch=0,
            grid=grid,
            in_specs=[
                pl.BlockSpec((tm, text_dim), lambda i: (i, 0)),
                pl.BlockSpec((tm, tech_dim), lambda i: (i, 0)),
                # Constant block index -> weights/bias VMEM-resident across grid.
                pl.BlockSpec((text_dim, out_dim), lambda i: (0, 0)),
                pl.BlockSpec((tech_dim, out_dim), lambda i: (0, 0)),
                pl.BlockSpec((1, out_dim), lambda i: (0, 0)),
            ],
            out_specs=pl.BlockSpec((tm, out_dim), lambda i: (i, 0)),
        ),
        compiler_params=pltpu.CompilerParams(
            dimension_semantics=("parallel",),
            vmem_limit_bytes=vmem_limit,
        ),
        cost_estimate=pl.CostEstimate(
            flops=flops, transcendentals=0, bytes_accessed=int(bytes_accessed)),
    )(text_features, technical_features, w_text, w_tech, b2d)


if __name__ == "__main__":
    # Small, module-consistent shapes.
    B = 64                     # batch
    TEXT_DIM = 32              # text_feature_dim
    TECH_DIM = 16              # technical_feature_dim
    OUT_DIM = 32               # output_dim

    key = jax.random.PRNGKey(0)
    k1, k2, k3, k4, k5, k6 = jax.random.split(key, 6)

    text = jax.random.normal(k1, (B, TEXT_DIM), dtype=jnp.float32)
    tech = jax.random.normal(k2, (B, TECH_DIM), dtype=jnp.float32)

    # Deterministic nn.Linear-style parameters (synthetic init, not a checkpoint).
    fan_in = TEXT_DIM + TECH_DIM
    bound = 1.0 / (fan_in ** 0.5)
    weight = jax.random.uniform(k3, (OUT_DIM, fan_in), jnp.float32, -bound, bound)
    bias = jax.random.uniform(k4, (OUT_DIM,), jnp.float32, -bound, bound)

    # Plain-JAX reference of the PyTorch forward.
    ref = jnp.concatenate([text, tech], axis=-1) @ weight.T + bias

    # f32 path, default tm -> single grid step for this tiny batch.
    params_f32 = prepare_fusion_params(weight, bias, TEXT_DIM, jnp.float32)
    out = jax.block_until_ready(simple_fusion_forward(text, tech, params_f32))
    assert out.shape == (B, OUT_DIM)
    assert jnp.allclose(out, ref, atol=1e-4, rtol=1e-4)

    # Multi-step grid coverage (correctness only; production should use big tm).
    B2 = 256
    text2 = jax.random.normal(k5, (B2, TEXT_DIM), dtype=jnp.float32)
    tech2 = jax.random.normal(k6, (B2, TECH_DIM), dtype=jnp.float32)
    ref2 = jnp.concatenate([text2, tech2], axis=-1) @ weight.T + bias
    out2 = jax.block_until_ready(
        simple_fusion_forward(text2, tech2, params_f32, tm=64))
    assert out2.shape == (B2, OUT_DIM)
    assert jnp.allclose(out2, ref2, atol=1e-4, rtol=1e-4)

    # bf16 MXU path (f32 activations fed directly; in-kernel cast; f32 accum,
    # bias and output), looser tolerance.
    params_bf16 = prepare_fusion_params(weight, bias, TEXT_DIM, jnp.bfloat16)
    out_bf = jax.block_until_ready(simple_fusion_forward(text, tech, params_bf16))
    assert out_bf.shape == (B, OUT_DIM)
    assert jnp.allclose(out_bf, ref, atol=3e-2, rtol=3e-2)

    print("KERNEL_OK")
</pallas_src>

<mosaic_0001>
module attributes {stable_mosaic.version = 11 : i64} {
  func.func @_fusion_kernel(%arg0: i32, %arg1: memref<64x32xf32, #tpu.memory_space<vmem>>, %arg2: memref<64x16xf32, #tpu.memory_space<vmem>>, %arg3: memref<32x32xf32, #tpu.memory_space<vmem>>, %arg4: memref<16x32xf32, #tpu.memory_space<vmem>>, %arg5: memref<1x32xf32, #tpu.memory_space<vmem>>, %arg6: memref<64x32xf32, #tpu.memory_space<vmem>>) attributes {dimension_semantics = [#tpu.dimension_semantics<parallel>], iteration_bounds = array<i64: 1>, scalar_prefetch = 0 : i64, scratch_operands = 0 : i64, tpu.core_type = #tpu.core_type<tc>, window_params = [{transform_indices = @transform_0, window_bounds = array<i64: 64, 32>}, {transform_indices = @transform_1, window_bounds = array<i64: 64, 16>}, {pipeline_mode = #tpu.pipeline_mode<synchronous>, transform_indices = @transform_2, window_bounds = array<i64: 32, 32>}, {pipeline_mode = #tpu.pipeline_mode<synchronous>, transform_indices = @transform_3, window_bounds = array<i64: 16, 32>}, {pipeline_mode = #tpu.pipeline_mode<synchronous>, transform_indices = @transform_4, window_bounds = array<i64: 1, 32>}, {transform_indices = @transform_5, window_bounds = array<i64: 64, 32>}]} {
    %c0 = arith.constant 0 : index
    %c0_0 = arith.constant 0 : index
    %0 = vector.load %arg1[%c0, %c0_0] : memref<64x32xf32, #tpu.memory_space<vmem>>, vector<64x32xf32>
    %c0_1 = arith.constant 0 : index
    %c0_2 = arith.constant 0 : index
    %1 = vector.load %arg2[%c0_1, %c0_2] : memref<64x16xf32, #tpu.memory_space<vmem>>, vector<64x16xf32>
    %c0_3 = arith.constant 0 : index
    %c0_4 = arith.constant 0 : index
    %2 = vector.load %arg3[%c0_3, %c0_4] : memref<32x32xf32, #tpu.memory_space<vmem>>, vector<32x32xf32>
    %cst = arith.constant dense<0.000000e+00> : vector<64x32xf32>
    %3 = tpu.matmul %0, %2, %cst {dimension_numbers = #tpu.dot_dimension_numbers<[1], [0], [0], [1], [0, 0, 1, 1], [], []>} : vector<64x32xf32>, vector<32x32xf32>, vector<64x32xf32> -> vector<64x32xf32>
    %c0_5 = arith.constant 0 : index
    %c0_6 = arith.constant 0 : index
    %4 = vector.load %arg4[%c0_5, %c0_6] : memref<16x32xf32, #tpu.memory_space<vmem>>, vector<16x32xf32>
    %cst_7 = arith.constant dense<0.000000e+00> : vector<64x32xf32>
    %5 = tpu.matmul %1, %4, %cst_7 {dimension_numbers = #tpu.dot_dimension_numbers<[1], [0], [0], [1], [0, 0, 1, 1], [], []>} : vector<64x16xf32>, vector<16x32xf32>, vector<64x32xf32> -> vector<64x32xf32>
    %6 = arith.addf %3, %5 : vector<64x32xf32>
    %c0_8 = arith.constant 0 : index
    %c0_9 = arith.constant 0 : index
    %7 = vector.load %arg5[%c0_8, %c0_9] : memref<1x32xf32, #tpu.memory_space<vmem>>, vector<1x32xf32>
    %8 = vector.broadcast %7 : vector<1x32xf32> to vector<64x32xf32>
    %9 = arith.addf %6, %8 : vector<64x32xf32>
    %c0_10 = arith.constant 0 : index
    %c0_11 = arith.constant 0 : index
    %10 = vector.load %arg6[%c0_10, %c0_11] : memref<64x32xf32, #tpu.memory_space<vmem>>, vector<64x32xf32>
    tpu.vector_store %arg6[%c0_10, %c0_11], %9 {strides = array<i32>} : memref<64x32xf32, #tpu.memory_space<vmem>>, vector<64x32xf32>,
    return
  }
  func.func @transform_0(%arg0: i32) -> (i32, i32) {
    %c0_i32 = arith.constant 0 : i32
    %c0_i32_0 = arith.constant 0 : i32
    return %arg0, %c0_i32 : i32, i32
  }
  func.func @transform_1(%arg0: i32) -> (i32, i32) {
    %c0_i32 = arith.constant 0 : i32
    %c0_i32_0 = arith.constant 0 : i32
    return %arg0, %c0_i32 : i32, i32
  }
  func.func @transform_2(%arg0: i32) -> (i32, i32) {
    %c0_i32 = arith.constant 0 : i32
    %c0_i32_0 = arith.constant 0 : i32
    %c0_i32_1 = arith.constant 0 : i32
    return %c0_i32, %c0_i32_0 : i32, i32
  }
  func.func @transform_3(%arg0: i32) -> (i32, i32) {
    %c0_i32 = arith.constant 0 : i32
    %c0_i32_0 = arith.constant 0 : i32
    %c0_i32_1 = arith.constant 0 : i32
    return %c0_i32, %c0_i32_0 : i32, i32
  }
  func.func @transform_4(%arg0: i32) -> (i32, i32) {
    %c0_i32 = arith.constant 0 : i32
    %c0_i32_0 = arith.constant 0 : i32
    %c0_i32_1 = arith.constant 0 : i32
    return %c0_i32, %c0_i32_0 : i32, i32
  }
  func.func @transform_5(%arg0: i32) -> (i32, i32) {
    %c0_i32 = arith.constant 0 : i32
    %c0_i32_0 = arith.constant 0 : i32
    return %arg0, %c0_i32 : i32, i32
  }
}

</mosaic_0001>

<bundles_post_ra>
// kernel: tpu_custom_call.1
= control target key start
LH: loop header
LB: loop body
LE: loop exit
PB: predicated region body
PF: predicated region fallthrough
CT: control target
= control target key end

     0   :  { %vm42_vm0 = vcmask 130048   ;;  %vm172_vm1 = vcmask 261120   ;;  %s551_s2 = inlined_call_operand.vmem [shape: f32[32,32], index: 2, kind: input, shape index: {}]   ;;  %s552_s3 = inlined_call_operand.vmem [shape: f32[16,32], index: 3, kind: input, shape index: {}]   ;;  %s553_s1 = inlined_call_operand.vmem [shape: f32[64,16], index: 1, kind: input, shape index: {}]   ;;  %s554_s0 = inlined_call_operand.vmem [shape: f32[64,32], index: 0, kind: input, shape index: {}]   ;;  %s555_s4 = inlined_call_operand.vmem [shape: f32[1,32], index: 4, kind: input, shape index: {}]   ;;  %s556_s5 = inlined_call_operand.vmem [shape: f32[64,32], index: 5, kind: output, shape index: {}]  }
   0x1   :  { %v39_v0 = vld [vmem:[%s551_s2 + $0x18] sm:$0xff]  ;;  %v41_v1 = vld [vmem:[%s552_s3 + $0x8] sm:$0xff]  ;;  %v38_v2 = vld [vmem:[%s551_s2 + $0x10] sm:$0xff] }
   0x2   :  { %384 = vmatprep.subr.mxu1 %v39_v0  ;;  %368 = vmatprep.subr.mxu0 %v41_v1  ;;  %v40_v3 = vld [vmem:[%s552_s3] sm:$0xff]  ;;  %v37_v4 = vld [vmem:[%s551_s2 + $0x8] sm:$0xff]  ;;  %v30_v9 = vld [vmem:[%s553_s1 + $0x10] sm:$0xff] }
   0x3   :  { %385 = vmatpush3.msra.mxu1 %v39_v0  ;;  %369 = vmatpush3.msra.mxu0 %v41_v1  ;;  %v28_v5 = vld [vmem:[%s553_s1] sm:$0xff]  ;;  %v29_v6 = vld [vmem:[%s553_s1 + $0x8] sm:$0xff]  ;;  %v31_v11 = vld [vmem:[%s553_s1 + $0x18] sm:$0xff] }
   0x4   :  { %386 = vmatprep.subr.mxu1 %v38_v2  ;;  %370 = vmatprep.subr.mxu0 %v40_v3  ;;  %v36_v7 = vld [vmem:[%s551_s2] sm:$0xff]  ;;  %v21_v10 = vld [vmem:[%s554_s0 + $0x8] sm:$0xff]  ;;  %v22_v12 = vld [vmem:[%s554_s0 + $0x10] sm:$0xff] }
   0x5   :  { %387 = vmatpush3.msra.mxu1 %v38_v2  ;;  %371 = vmatpush3.msra.mxu0 %v40_v3  ;;  %v20_v8 = vld [vmem:[%s554_s0] sm:$0xff]  ;;  %v23_v14 = vld [vmem:[%s554_s0 + $0x18] sm:$0xff]  ;;  %v33_v15 = vld [vmem:[%s553_s1 + $0x28] sm:$0xff] }
   0x6   :  { %388 = vmatprep.subr.mxu1 %v37_v4  ;;  %372 = vmatprep.mubr.msk.f32.mxu0 %vm42_vm0, %v28_v5  ;;  %v32_v13 = vld [vmem:[%s553_s1 + $0x20] sm:$0xff]  ;;  %v34_v17 = vld [vmem:[%s553_s1 + $0x30] sm:$0xff]  ;;  %v25_v18 = vld [vmem:[%s554_s0 + $0x28] sm:$0xff] }
   0x7   :  { %389 = vmatpush3.msra.mxu1 %v37_v4  ;;  %373 = vmatmul.mubr.msk.f32.vlgmr.msra.gmra.mxu0 %vm42_vm0, %v29_v6  ;;  %v24_v16 = vld [vmem:[%s554_s0 + $0x20] sm:$0xff]  ;;  %v35_v19 = vld [vmem:[%s553_s1 + $0x38] sm:$0xff]  ;;  %v26_v20 = vld [vmem:[%s554_s0 + $0x30] sm:$0xff] }
   0x8   :  { %390 = vmatprep.subr.mxu1 %v36_v7  ;;  %392 = vmatprep.mubr.msk.f32.mxu1 %vm172_vm1, %v20_v8  ;;  %v27_v21 = vld [vmem:[%s554_s0 + $0x38] sm:$0xff]  ;;  %v345_v25 = vld [vmem:[%s555_s4] ss:$0 sm:$0xff] }
   0x9   :  { %391 = vmatpush3.msra.mxu1 %v36_v7  ;;  %375 = vmatprep.mubr.msk.f32.mxu0 %vm42_vm0, %v30_v9 }
   0xa   :  { %393 = vmatmul.mubr.msk.f32.vlgmr.msra.gmra.mxu1 %vm172_vm1, %v21_v10 }
   0xb   :  { %376 = vmatmul.mubr.msk.f32.gmra.mxu0 %vm42_vm0, %v31_v11  ;;  %395 = vmatprep.mubr.msk.f32.mxu1 %vm172_vm1, %v22_v12 }
   0xc   :  { %378 = vmatprep.mubr.msk.f32.mxu0 %vm42_vm0, %v32_v13 }
   0xe   :  { %396 = vmatmul.mubr.msk.f32.gmra.mxu1 %vm172_vm1, %v23_v14 }
   0xf   :  { %379 = vmatmul.mubr.msk.f32.gmra.mxu0 %vm42_vm0, %v33_v15  ;;  %398 = vmatprep.mubr.msk.f32.mxu1 %vm172_vm1, %v24_v16 }
  0x10   :  { %381 = vmatprep.mubr.msk.f32.mxu0 %vm42_vm0, %v34_v17 }
  0x12   :  { %399 = vmatmul.mubr.msk.f32.gmra.mxu1 %vm172_vm1, %v25_v18 }
  0x13   :  { %382 = vmatmul.mubr.msk.f32.gmra.mxu0 %vm42_vm0, %v35_v19  ;;  %401 = vmatprep.mubr.msk.f32.mxu1 %vm172_vm1, %v26_v20 }
  0x16   :  { %402 = vmatmul.mubr.msk.f32.gmra.mxu1 %vm172_vm1, %v27_v21 }
  0xc7   :  { %v374_v22 = vpop.f32.mrf.mxu0 }
  0xc9   :  { %v133_v23 = vpop.f32.mrf.mxu0 }
  0xca   :  { %v394_v24 = vpop.f32.mrf.mxu1 }
  0xcb   :  { %v269_v26 = vadd.f32 %v394_v24, %v374_v22  ;;  %v377_v27 = vpop.f32.mrf.mxu0 }
  0xcc   :  { %v263_v28 = vpop.f32.mrf.mxu1 }
  0xcd   :  { %v310_v29 = vadd.f32 %v345_v25, %v269_v26  ;;  %v264_v30 = vadd.f32 %v263_v28, %v133_v23  ;;  %v143_v31 = vpop.f32.mrf.mxu0 }
  0xce   :  { %v397_v32 = vpop.f32.mrf.mxu1 }
  0xcf   :  { %318 = vst.msk [vmem:[%s556_s5 + $0x8] sm:$0xff] %vm172_vm1, %v310_v29  ;;  %v309_v33 = vadd.f32 %v345_v25, %v264_v30  ;;  %v279_v34 = vadd.f32 %v397_v32, %v377_v27  ;;  %v380_v35 = vpop.f32.mrf.mxu0 }
  0xd0   :  { %v273_v36 = vpop.f32.mrf.mxu1 }
  0xd1   :  { %317 = vst.msk [vmem:[%s556_s5] sm:$0xff] %vm172_vm1, %v309_v33  ;;  %v312_v37 = vadd.f32 %v345_v25, %v279_v34  ;;  %v274_v38 = vadd.f32 %v273_v36, %v143_v31  ;;  %v153_v39 = vpop.f32.mrf.mxu0 }
  0xd2   :  { %v400_v40 = vpop.f32.mrf.mxu1 }
  0xd3   :  { %320 = vst.msk [vmem:[%s556_s5 + $0x18] sm:$0xff] %vm172_vm1, %v312_v37  ;;  %v311_v41 = vadd.f32 %v345_v25, %v274_v38  ;;  %v289_v42 = vadd.f32 %v400_v40, %v380_v35  ;;  %v383_v43 = vpop.f32.mrf.mxu0 }
  0xd4   :  { %v283_v44 = vpop.f32.mrf.mxu1 }
  0xd5   :  { %319 = vst.msk [vmem:[%s556_s5 + $0x10] sm:$0xff] %vm172_vm1, %v311_v41  ;;  %v314_v45 = vadd.f32 %v345_v25, %v289_v42  ;;  %v284_v46 = vadd.f32 %v283_v44, %v153_v39  ;;  %v163_v50 = vpop.f32.mrf.mxu0 }
  0xd6   :  { %v403_v47 = vpop.f32.mrf.mxu1 }
  0xd7   :  { %322 = vst.msk [vmem:[%s556_s5 + $0x28] sm:$0xff] %vm172_vm1, %v314_v45  ;;  %v313_v48 = vadd.f32 %v345_v25, %v284_v46  ;;  %v299_v49 = vadd.f32 %v403_v47, %v383_v43 }
  0xd8   :  { %v293_v51 = vpop.f32.mrf.mxu1 }
  0xd9   :  { %321 = vst.msk [vmem:[%s556_s5 + $0x20] sm:$0xff] %vm172_vm1, %v313_v48  ;;  %v316_v52 = vadd.f32 %v345_v25, %v299_v49  ;;  %v294_v53 = vadd.f32 %v293_v51, %v163_v50 }
  0xdb   :  { %324 = vst.msk [vmem:[%s556_s5 + $0x38] sm:$0xff] %vm172_vm1, %v316_v52  ;;  %v315_v54 = vadd.f32 %v345_v25, %v294_v53 }
  0xdd   :  { %323 = vst.msk [vmem:[%s556_s5 + $0x30] sm:$0xff] %vm172_vm1, %v315_v54 }

</bundles_post_ra>
